<compile_context>
chip_gen: v6e
topology: v6e:2x2x1
jax: 0.10.0
libtpu: 0.0.40
codegen_flags: <defaults>
</compile_context>

<pallas_src>
import functools

import jax
import jax.numpy as jnp
from jax.experimental import pallas as pl
from jax.experimental.pallas import tpu as pltpu


def gem_kernel(p_ref, x_ref, o_ref, *, eps, hw, chunk_rows, n_chunks,
               tile_rows, nc_total):
    # p_ref: (1, 1) scalar exponent in SMEM
    # x_ref: (tile_rows, HW) tile in VMEM
    # o_ref: (tile_rows, 1) output tile in VMEM
    p = p_ref[0, 0]
    inv_p = 1.0 / p
    # Module default p == 3: pure-VPU cube path (keeps the kernel HBM-bound;
    # the exp/log path is EUP-bound on v5e/v7x).  Runtime branch so it works
    # under jit with a traced learnable p.
    is_p3 = jnp.abs(p - 3.0) < 1e-6

    # Fold the 1/(H*W) mean scale into the constant reduction vector so the
    # row-sum runs on the MXU (one vmatmul push per input vreg) instead of the
    # XLU rotate/add tree.
    ones_scaled = jnp.full((hw, 1), 1.0 / hw, dtype=jnp.float32)

    tile_start = pl.program_id(0) * tile_rows

    @pl.loop(0, n_chunks)
    def _(c):
        start = pl.multiple_of(c * chunk_rows, chunk_rows)

        # Skip chunks that are entirely past the end of the real data (only
        # happens in the ragged last grid tile); partially-valid chunks are
        # computed fully — their garbage rows are dropped on writeback.
        @pl.when(tile_start + start < nc_total)
        def _():
            x = x_ref[pl.ds(start, chunk_rows), :].astype(jnp.float32)
            x = jnp.maximum(x, eps)                       # clamp(min=eps)

            def reduce_and_store(xp):
                # Mean over H*W on the MXU; output rows are independent.
                m = jnp.dot(xp, ones_scaled,
                            preferred_element_type=jnp.float32)
                # m ** (1/p); m >= eps**p > 0 so log is safe.
                o_ref[pl.ds(start, chunk_rows), :] = jnp.exp(
                    jnp.log(m) * inv_p).astype(o_ref.dtype)

            @pl.when(is_p3)
            def _():
                reduce_and_store(x * x * x)               # 2 VPU muls

            @pl.when(jnp.logical_not(is_p3))
            def _():
                # x >= eps > 0, so exp(p*log(x)) == x**p.
                reduce_and_store(jnp.exp(p * jnp.log(x)))


def gem_pallas(x, p, eps=1e-6, tile_rows=None):
    """x: (N, C, H, W); p: (1,) learnable exponent. Returns (N, C, 1, 1)."""
    N, C, H, W = x.shape
    NC, HW = N * C, H * W
    x2 = x.reshape(NC, HW)
    p2 = jnp.asarray(p, jnp.float32).reshape(1, 1)

    itemsize = x.dtype.itemsize
    HW_pad = -(-HW // 128) * 128            # lanes pad to 128 in VMEM
    sub = 8 * (4 // itemsize)               # sublane packing: 8 f32 / 16 bf16
    nc_pad = -(-NC // sub) * sub

    # Compute chunk: bounds the f32 intermediates (clamped x, x**p) that
    # Mosaic materializes in VMEM to ~2 MiB each, independent of DMA tile size.
    chunk_rows = max(sub, ((2 << 20) // (HW_pad * 4)) // sub * sub)
    chunk_rows = min(chunk_rows, nc_pad)
    if tile_rows is not None:
        chunk_rows = max(sub, min(chunk_rows, (tile_rows // sub) * sub))

    # DMA tile: ~8 MiB of *lane-padded* input per buffer (16 MiB double
    # buffered) to amortize the ~0.35 us per-grid-step overhead even at v7x
    # HBM speeds, while still fitting v7x's 64 MiB physical VMEM.
    if tile_rows is None:
        n_chunks = max(1, (8 << 20) // (chunk_rows * HW_pad * itemsize))
    else:
        n_chunks = max(1, tile_rows // chunk_rows)
    n_chunks = min(n_chunks, -(-NC // chunk_rows))
    rows = chunk_rows * n_chunks
    # Ragged last tile instead of jnp.pad: OOB reads are garbage rows (the
    # reduction is row-independent) and OOB writes are dropped by Pallas.
    num_tiles = -(-NC // rows)

    kernel = functools.partial(
        gem_kernel, eps=float(eps), hw=HW, chunk_rows=chunk_rows,
        n_chunks=n_chunks, tile_rows=rows, nc_total=NC)

    # VMEM budget with lane-padded widths: double-buffered input tile + f32
    # per-chunk intermediates + slack, with ~50% headroom (capped under v7x's
    # 64 MiB physical VMEM; v5e/v6e have 128 MiB physical).
    vmem_need = (2 * rows * HW_pad * itemsize
                 + 4 * chunk_rows * HW_pad * 4
                 + (1 << 20))
    vmem_limit = int(min(max(int(vmem_need * 1.5), 16 << 20), 48 << 20))

    cost = pl.CostEstimate(
        flops=6 * NC * HW,
        transcendentals=2 * NC * HW + 2 * NC,
        bytes_accessed=NC * HW * itemsize + NC * itemsize,
    )

    out = pl.pallas_call(
        kernel,
        out_shape=jax.ShapeDtypeStruct((NC, 1), x.dtype),
        grid=(num_tiles,),
        in_specs=[
            pl.BlockSpec((1, 1), lambda i: (0, 0),
                         memory_space=pltpu.MemorySpace.SMEM),
            pl.BlockSpec((rows, HW), lambda i: (i, 0)),
        ],
        out_specs=pl.BlockSpec((rows, 1), lambda i: (i, 0)),
        compiler_params=pltpu.CompilerParams(
            dimension_semantics=("parallel",),
            vmem_limit_bytes=vmem_limit),
        cost_estimate=cost,
    )(p2, x2)

    return out.reshape(N, C, 1, 1)


def gem_reference(x, p, eps=1e-6):
    p0 = jnp.asarray(p, jnp.float32).reshape(())
    xc = jnp.maximum(x, eps)
    xp = xc ** p0
    m = jnp.mean(xp, axis=(-2, -1), keepdims=True)
    return m ** (1.0 / p0)


if __name__ == "__main__":
    eps = 1e-6
    k0, k1 = jax.random.split(jax.random.PRNGKey(0))

    # 1) Module-default case: p = ones(1) * 3 (runtime VPU cube fast path).
    N, C, H, W = 2, 4, 16, 16
    x = jax.random.normal(k0, (N, C, H, W), dtype=jnp.float32)
    p = jnp.ones((1,), dtype=jnp.float32) * 3.0

    out = gem_pallas(x, p, eps)
    jax.block_until_ready(out)
    ref = gem_reference(x, p, eps)
    assert out.shape == (N, C, 1, 1)
    assert jnp.allclose(out, ref, rtol=1e-4, atol=1e-5)

    # 2) Non-integer p: exercises the dynamic exp/log branch (also under jit).
    p_dyn = jnp.array([2.5], dtype=jnp.float32)
    out_dyn = jax.jit(gem_pallas, static_argnames=("eps",))(x, p_dyn, eps)
    jax.block_until_ready(out_dyn)
    ref_dyn = gem_reference(x, p_dyn, eps)
    assert jnp.allclose(out_dyn, ref_dyn, rtol=1e-4, atol=1e-5)

    # 3) Multi-tile grid with a ragged (unpadded) last tile, HW=49 < 128.
    x2 = jax.random.normal(k1, (2, 37, 7, 7), dtype=jnp.float32)
    out2 = gem_pallas(x2, p, eps, tile_rows=16)
    jax.block_until_ready(out2)
    ref2 = gem_reference(x2, p, eps)
    assert out2.shape == (2, 37, 1, 1)
    assert jnp.allclose(out2, ref2, rtol=1e-4, atol=1e-5)

    print("KERNEL_OK")
</pallas_src>

<mosaic_0001>
module attributes {stable_mosaic.version = 11 : i64} {
  func.func @gem_kernel(%arg0: i32, %arg1: memref<1x1xf32, #tpu.memory_space<smem>>, %arg2: memref<8x256xf32, #tpu.memory_space<vmem>>, %arg3: memref<8x1xf32, #tpu.memory_space<vmem>>) attributes {dimension_semantics = [#tpu.dimension_semantics<parallel>], iteration_bounds = array<i64: 1>, scalar_prefetch = 0 : i64, scratch_operands = 0 : i64, tpu.core_type = #tpu.core_type<tc>, window_params = [{transform_indices = @transform_0, window_bounds = array<i64: 1, 1>}, {transform_indices = @transform_1, window_bounds = array<i64: 8, 256>}, {transform_indices = @transform_2, window_bounds = array<i64: 8, 1>}]} {
    %c0 = arith.constant 0 : index
    %c0_0 = arith.constant 0 : index
    %0 = memref.load %arg1[%c0, %c0_0] : memref<1x1xf32, #tpu.memory_space<smem>>
    %cst = arith.constant 1.000000e+00 : f32
    %1 = arith.divf %cst, %0 : f32
    %cst_1 = arith.constant 3.000000e+00 : f32
    %2 = arith.subf %0, %cst_1 : f32
    %3 = math.absf %2 : f32
    %cst_2 = arith.constant 9.99999997E-7 : f32
    %4 = arith.cmpf olt, %3, %cst_2 : f32
    %cst_3 = arith.constant 3.906250e-03 : f32
    %5 = vector.broadcast %cst_3 : f32 to vector<256x1xf32>
    %c8_i32 = arith.constant 8 : i32
    %6 = arith.muli %arg0, %c8_i32 : i32
    %c0_i32 = arith.constant 0 : i32
    %c1_i32 = arith.constant 1 : i32
    %7 = arith.muli %c0_i32, %c1_i32 : i32
    %c0_i32_4 = arith.constant 0 : i32
    %8 = arith.addi %c0_i32_4, %7 : i32
    %c8_i32_5 = arith.constant 8 : i32
    %9 = arith.muli %8, %c8_i32_5 : i32
    %10 = tpu.assume_multiple %9, 8 : i32
    %11 = arith.addi %6, %10 : i32
    %c8_i32_6 = arith.constant 8 : i32
    %12 = arith.cmpi slt, %11, %c8_i32_6 : i32
    %13 = arith.extui %12 : i1 to i32
    %c0_i32_7 = arith.constant 0 : i32
    %14 = arith.cmpi ne, %13, %c0_i32_7 : i32
    scf.if %14 {
      %15 = arith.index_cast %10 : i32 to index
      %c0_9 = arith.constant 0 : index
      %16 = vector.load %arg2[%15, %c0_9] : memref<8x256xf32, #tpu.memory_space<vmem>>, vector<8x256xf32>
      %cst_10 = arith.constant 9.99999997E-7 : f32
      %17 = vector.broadcast %cst_10 : f32 to vector<8x256xf32>
      %18 = arith.maximumf %16, %17 : vector<8x256xf32>
      %19 = arith.extui %4 : i1 to i32
      %c0_i32_11 = arith.constant 0 : i32
      %20 = arith.cmpi ne, %19, %c0_i32_11 : i32
      scf.if %20 {
        %24 = arith.mulf %18, %18 : vector<8x256xf32>
        %25 = arith.mulf %24, %18 : vector<8x256xf32>
        %cst_13 = arith.constant dense<0.000000e+00> : vector<8x1xf32>
        %26 = tpu.matmul %25, %5, %cst_13 {dimension_numbers = #tpu.dot_dimension_numbers<[1], [0], [0], [1], [0, 0, 1, 1], [], []>} : vector<8x256xf32>, vector<256x1xf32>, vector<8x1xf32> -> vector<8x1xf32>
        %27 = math.log %26 : vector<8x1xf32>
        %28 = vector.broadcast %1 : f32 to vector<8x1xf32>
        %29 = arith.mulf %27, %28 : vector<8x1xf32>
        %30 = math.exp %29 : vector<8x1xf32>
        %31 = arith.index_cast %10 : i32 to index
        %c0_14 = arith.constant 0 : index
        %32 = vector.load %arg3[%31, %c0_14] : memref<8x1xf32, #tpu.memory_space<vmem>>, vector<8x1xf32>
        tpu.vector_store %arg3[%31, %c0_14], %30 {strides = array<i32>} : memref<8x1xf32, #tpu.memory_space<vmem>>, vector<8x1xf32>,
      } else {
      }
      %true = arith.constant true
      %21 = arith.xori %4, %true : i1
      %22 = arith.extui %21 : i1 to i32
      %c0_i32_12 = arith.constant 0 : i32
      %23 = arith.cmpi ne, %22, %c0_i32_12 : i32
      scf.if %23 {
        %24 = math.log %18 : vector<8x256xf32>
        %25 = vector.broadcast %0 : f32 to vector<8x256xf32>
        %26 = arith.mulf %25, %24 : vector<8x256xf32>
        %27 = math.exp %26 : vector<8x256xf32>
        %cst_13 = arith.constant dense<0.000000e+00> : vector<8x1xf32>
        %28 = tpu.matmul %27, %5, %cst_13 {dimension_numbers = #tpu.dot_dimension_numbers<[1], [0], [0], [1], [0, 0, 1, 1], [], []>} : vector<8x256xf32>, vector<256x1xf32>, vector<8x1xf32> -> vector<8x1xf32>
        %29 = math.log %28 : vector<8x1xf32>
        %30 = vector.broadcast %1 : f32 to vector<8x1xf32>
        %31 = arith.mulf %29, %30 : vector<8x1xf32>
        %32 = math.exp %31 : vector<8x1xf32>
        %33 = arith.index_cast %10 : i32 to index
        %c0_14 = arith.constant 0 : index
        %34 = vector.load %arg3[%33, %c0_14] : memref<8x1xf32, #tpu.memory_space<vmem>>, vector<8x1xf32>
        tpu.vector_store %arg3[%33, %c0_14], %32 {strides = array<i32>} : memref<8x1xf32, #tpu.memory_space<vmem>>, vector<8x1xf32>,
      } else {
      }
    } else {
    }
    %c1_i32_8 = arith.constant 1 : i32
    return
  }
  func.func @transform_0(%arg0: i32) -> (i32, i32) {
    %c0_i32 = arith.constant 0 : i32
    %c0_i32_0 = arith.constant 0 : i32
    %c0_i32_1 = arith.constant 0 : i32
    return %c0_i32, %c0_i32_0 : i32, i32
  }
  func.func @transform_1(%arg0: i32) -> (i32, i32) {
    %c0_i32 = arith.constant 0 : i32
    %c0_i32_0 = arith.constant 0 : i32
    return %arg0, %c0_i32 : i32, i32
  }
  func.func @transform_2(%arg0: i32) -> (i32, i32) {
    %c0_i32 = arith.constant 0 : i32
    %c0_i32_0 = arith.constant 0 : i32
    return %arg0, %c0_i32 : i32, i32
  }
}

</mosaic_0001>

<bundles_post_ra>
// kernel: tpu_custom_call.1
= control target key start
LH: loop header
LB: loop body
LE: loop exit
PB: predicated region body
PF: predicated region fallthrough
CT: control target
= control target key end

     0   :  { %8 = vsyncpa [#allocation4], 0  ;;  %s342_s9 = smov [#allocation3]   ;;  %s391_s0 = inlined_call_operand.<no memory space> [shape: f32[1,1], index: 0, kind: input, shape index: {}]   ;;  %s392_s1 = inlined_call_operand.hbm [shape: f32[8,256], index: 1, kind: input, shape index: {}]   ;;  %s393_s2 = inlined_call_operand.vmem [shape: f32[8,1], index: 2, kind: output, shape index: {}]  }
   0x1   :  { %s17_s10 = sshll.u32 %s342_s9, 4  ;;  %s18_s10 = int_to_ptr.vmem [resolvable:$true] %s17_s10 }
   0x2   :  { %s328_s11 = scalar_lea.vmem %s18_s10, 256  ;;  %p333_p1 = scmp.lt.s32.totalorder %s18_s10, %s18_s10 }
   0x3   :  { %p329_p0 = scmp.ne.s32.totalorder %s18_s10, %s328_s11  ;;  %p334_p2 = scmp.lt.s32.totalorder %s328_s11, %s328_s11 }
   0x5   :  { %p335_p3 = por %p334_p2, %p333_p1 }
   0x7   :  { %p336_p4 = pnand %p335_p3, %p329_p0 }
   0x9   :  { %339 = shalt.err (!%p336_p4)
}
   0xa   :  { %20 = dma.hbm_to_vmem [thread:$0]  %s392_s1, 256, %s18_s10, [#allocation4]   ;;  %v366_v0 = vstv %s391_s0 }
   0xb   :  { %340 = dma.done.wait [#allocation4], 256  }
   0xc   :  { %341 = vsyncadd [#allocation4], 4294967040  ;;  %s226_s18 = sadd.f32 -3.0, %s391_s0  ;;  %302 = vrcp.f32 %v366_v0  ;;  %v40_v1 = vld [vmem:[#allocation3] sm:$0xff]  ;;  %v41_v2 = vld [vmem:[#allocation3 + $0x8] sm:$0xff] }
   0xd   :  { %v42_v3 = vmax.f32 %v40_v1, 1e-06  ;;  %v43_v4 = vmax.f32 %v41_v2, 1e-06 }
   0xe   :  { %s372_s19 = sand.u32 2147483647, %s226_s18 }
   0xf   :  { %p30_p5 = scmp.lt.f32.partialorder %s372_s19, 1e-06 }
  0x10   :  { %v48_v6 = vmul.f32 (%p30_p5), %v43_v4, %v43_v4  ;;  %v343_v7 = vmov (%p30_p5), 0.00390625   ;;  %v47_v9 = vmul.f32 (%p30_p5), %v42_v3, %v42_v3  ;;  %vm127_vm0 = vcmask (%p30_p5), 7168  }
  0x11   :  { %227 = vmatprep.subr.mxu0 (%p30_p5), %v343_v7 }
  0x12   :  { %228 = vmatpush3.msra.mxu0 (%p30_p5), %v343_v7  ;;  %v50_v8 = vmul.f32 (%p30_p5), %v48_v6, %v43_v4  ;;  %v49_v10 = vmul.f32 (%p30_p5), %v47_v9, %v42_v3 }
  0x13   :  { %229 = vmatprep.subr.mxu0 (%p30_p5), %v343_v7 }
  0x14   :  { %230 = vmatpush3.msra.mxu0 (%p30_p5), %v343_v7  ;;  %115 = vmatprep.mubr.f32.mxu0 (%p30_p5), %v50_v8 }
  0x15   :  { %231 = vmatprep.subr.mxu0 (%p30_p5), %v343_v7 }
  0x16   :  { %232 = vmatpush3.msra.mxu0 (%p30_p5), %v343_v7 }
  0x17   :  { %233 = vmatprep.subr.mxu0 (%p30_p5), %v343_v7 }
  0x18   :  { %234 = vmatpush3.msra.mxu0 (%p30_p5), %v343_v7 }
  0x19   :  { %v303_v5 = vpop.eup %302  ;;  %235 = vmatprep.subr.mxu0 (%p30_p5), %v343_v7 }
  0x1a   :  { %297 = vpush %v303_v5  ;;  %236 = vmatpush3.msra.mxu0 (%p30_p5), %v343_v7 }
  0x1b   :  { %237 = vmatprep.subr.mxu0 (%p30_p5), %v343_v7 }
  0x1c   :  { %238 = vmatpush3.msra.mxu0 (%p30_p5), %v343_v7 }
  0x1d   :  { %239 = vmatprep.subr.mxu0 (%p30_p5), %v343_v7 }
  0x1e   :  { %240 = vmatpush3.msra.mxu0 (%p30_p5), %v343_v7 }
  0x1f   :  { %241 = vmatprep.subr.mxu0 (%p30_p5), %v343_v7 }
  0x20   :  { %242 = vmatpush3.msra.mxu0 (%p30_p5), %v343_v7 }
  0x21   :  { %243 = vmatprep.subr.mxu0 (%p30_p5), %v343_v7 }
  0x22   :  { %244 = vmatpush3.msra.mxu0 (%p30_p5), %v343_v7 }
  0x23   :  { %245 = vmatprep.subr.mxu0 (%p30_p5), %v343_v7 }
  0x24   :  { %246 = vmatpush3.msra.mxu0 (%p30_p5), %v343_v7 }
  0x25   :  { %247 = vmatprep.subr.mxu0 (%p30_p5), %v343_v7 }
  0x26   :  { %248 = vmatpush3.msra.mxu0 (%p30_p5), %v343_v7 }
  0x27   :  { %249 = vmatprep.subr.mxu0 (%p30_p5), %v343_v7 }
  0x28   :  { %250 = vmatpush3.msra.mxu0 (%p30_p5), %v343_v7 }
  0x29   :  { %251 = vmatprep.subr.mxu0 (%p30_p5), %v343_v7 }
  0x2a   :  { %252 = vmatpush3.msra.mxu0 (%p30_p5), %v343_v7 }
  0x2b   :  { %253 = vmatprep.subr.mxu0 (%p30_p5), %v343_v7 }
  0x2c   :  { %254 = vmatpush3.msra.mxu0 (%p30_p5), %v343_v7 }
  0x2d   :  { %255 = vmatprep.subr.mxu0 (%p30_p5), %v343_v7 }
  0x2e   :  { %256 = vmatpush3.msra.mxu0 (%p30_p5), %v343_v7 }
  0x2f   :  { %257 = vmatprep.subr.mxu0 (%p30_p5), %v343_v7 }
  0x30   :  { %258 = vmatpush3.msra.mxu0 (%p30_p5), %v343_v7 }
  0x31   :  { %116 = vmatmul.mubr.f32.vlgmr.msra.gmra.mxu0 (%p30_p5), %v49_v10 }
  0x47   :  { %46 = sbr.rel (!%p30_p5) target bundleno = 281 (0x119), region = 21 }
  0x4b   :  { %s375_s1 = spop %297 }
  0x4c   :  { %v123_v15 = vstv %s375_s1 }
  0xf1   :  { %v259_v11 = vpop.f32.mrf.mxu0 }
  0xf3   :  { %v260_v12 = vpop.f32.mrf.mxu0 }
  0xf4   :  { %v261_v13 = vadd.f32 %v260_v12, %v259_v11 }
  0xf6   :  { %304 = vlog2.f32 %v261_v13 }
 0x103   :  { %v305_v14 = vpop.eup %304 }
 0x104   :  { %v122_v16 = vmul.f32 0.6931472, %v305_v14 }
 0x106   :  { %v124_v17 = vmul.f32 %v123_v15, %v122_v16 }
 0x108   :  { %v125_v18 = vmul.f32 1.442695, %v124_v17 }
 0x10a   :  { %306 = vpow2.f32 %v125_v18 }
 0x117   :  { %v307_v19 = vpop.eup %306 }
 0x118   :  { %128 = vst.msk [vmem:[%s393_s2] sm:$0xff] %vm127_vm0, %v307_v19 }
 0x119 PF:  { %131 = sbr.rel (%p30_p5) target bundleno = 553 (0x229), region = 25 }
 0x11e   :  { %308 = vlog2.f32 %v43_v4  ;;  %v344_v20 = vmov 0.00390625   ;;  %v215_v35 = vstv %s375_s1  ;;  %vm219_vm1 = vcmask 7168  }
 0x11f   :  { %262 = vmatprep.subr.mxu0 %v344_v20  ;;  %310 = vlog2.f32 %v42_v3 }
 0x120   :  { %263 = vmatpush3.msra.mxu0 %v344_v20 }
 0x121   :  { %264 = vmatprep.subr.mxu0 %v344_v20 }
 0x122   :  { %265 = vmatpush3.msra.mxu0 %v344_v20 }
 0x123   :  { %266 = vmatprep.subr.mxu0 %v344_v20 }
 0x124   :  { %267 = vmatpush3.msra.mxu0 %v344_v20 }
 0x125   :  { %268 = vmatprep.subr.mxu0 %v344_v20 }
 0x126   :  { %269 = vmatpush3.msra.mxu0 %v344_v20 }
 0x127   :  { %270 = vmatprep.subr.mxu0 %v344_v20 }
 0x128   :  { %271 = vmatpush3.msra.mxu0 %v344_v20 }
 0x129   :  { %272 = vmatprep.subr.mxu0 %v344_v20 }
 0x12a   :  { %273 = vmatpush3.msra.mxu0 %v344_v20 }
 0x12b   :  { %v309_v21 = vpop.eup %308  ;;  %274 = vmatprep.subr.mxu0 %v344_v20 }
 0x12c   :  { %v311_v22 = vpop.eup %310  ;;  %275 = vmatpush3.msra.mxu0 %v344_v20  ;;  %v135_v23 = vmul.f32 0.6931472, %v309_v21 }
 0x12d   :  { %276 = vmatprep.subr.mxu0 %v344_v20  ;;  %v133_v24 = vmul.f32 0.6931472, %v311_v22 }
 0x12e   :  { %277 = vmatpush3.msra.mxu0 %v344_v20  ;;  %v138_v25 = vmul.f32 %v135_v23, %v366_v0 }
 0x12f   :  { %278 = vmatprep.subr.mxu0 %v344_v20  ;;  %v137_v26 = vmul.f32 %v133_v24, %v366_v0 }
 0x130   :  { %279 = vmatpush3.msra.mxu0 %v344_v20  ;;  %v141_v27 = vmul.f32 1.442695, %v138_v25 }
 0x131   :  { %280 = vmatprep.subr.mxu0 %v344_v20  ;;  %v139_v28 = vmul.f32 1.442695, %v137_v26 }
 0x132   :  { %281 = vmatpush3.msra.mxu0 %v344_v20  ;;  %312 = vpow2.f32 %v141_v27 }
 0x133   :  { %282 = vmatprep.subr.mxu0 %v344_v20  ;;  %314 = vpow2.f32 %v139_v28 }
 0x134   :  { %283 = vmatpush3.msra.mxu0 %v344_v20 }
 0x135   :  { %284 = vmatprep.subr.mxu0 %v344_v20 }
 0x136   :  { %285 = vmatpush3.msra.mxu0 %v344_v20 }
 0x137   :  { %286 = vmatprep.subr.mxu0 %v344_v20 }
 0x138   :  { %287 = vmatpush3.msra.mxu0 %v344_v20 }
 0x139   :  { %288 = vmatprep.subr.mxu0 %v344_v20 }
 0x13a   :  { %289 = vmatpush3.msra.mxu0 %v344_v20 }
 0x13b   :  { %290 = vmatprep.subr.mxu0 %v344_v20 }
 0x13c   :  { %291 = vmatpush3.msra.mxu0 %v344_v20 }
 0x13d   :  { %292 = vmatprep.subr.mxu0 %v344_v20 }
 0x13e   :  { %293 = vmatpush3.msra.mxu0 %v344_v20 }
 0x13f   :  { %v313_v29 = vpop.eup %312 }
 0x140   :  { %v315_v30 = vpop.eup %314  ;;  %207 = vmatprep.mubr.f32.mxu0 %v313_v29 }
 0x141   :  { %208 = vmatmul.mubr.f32.vlgmr.msra.gmra.mxu0 %v315_v30 }
 0x201   :  { %v294_v31 = vpop.f32.mrf.mxu0 }
 0x203   :  { %v295_v32 = vpop.f32.mrf.mxu0 }
 0x204   :  { %v296_v33 = vadd.f32 %v295_v32, %v294_v31 }
 0x206   :  { %316 = vlog2.f32 %v296_v33 }
 0x213   :  { %v317_v34 = vpop.eup %316 }
 0x214   :  { %v214_v36 = vmul.f32 0.6931472, %v317_v34 }
 0x216   :  { %v216_v37 = vmul.f32 %v215_v35, %v214_v36 }
 0x218   :  { %v217_v38 = vmul.f32 1.442695, %v216_v37 }
 0x21a   :  { %318 = vpow2.f32 %v217_v38 }
 0x227   :  { %v319_v39 = vpop.eup %318 }
 0x228   :  { %220 = vst.msk [vmem:[%s393_s2] sm:$0xff] %vm219_vm1, %v319_v39 }
 0x229 PF:  { %225 = vsyncpa [#allocation4], 1 }

</bundles_post_ra>
